<compile_context>
chip_gen: v5e
topology: v5e:2x2
jax: 0.10.0
libtpu: 0.0.40
codegen_flags: <defaults>
</compile_context>

<pallas_src>
import functools

import jax
import jax.numpy as jnp
from jax.experimental import pallas as pl
from jax.experimental.pallas import tpu as pltpu

_LANE = 128      # lane width (last dim)
_SUBLANE = 8     # f32 sublane tile (second-to-last dim)


def _round_up(x, m):
    return (x + m - 1) // m * m


def _fused_mlp_kernel(*refs, num_layers):
    """refs = (x_ref, w0_ref, b0_ref, w1_ref, b1_ref, ..., o_ref).

    Computes h = relu(h @ w_i + b_i) for every layer on one batch tile.
    All intermediates stay in vregs/VMEM (no HBM writeback between layers).
    """
    x_ref = refs[0]
    o_ref = refs[-1]
    wb_refs = refs[1:-1]

    h = x_ref[...].astype(jnp.float32)
    for i in range(num_layers):                  # statically unrolled chain
        w = wb_refs[2 * i][...]                  # (IN_pad, OUT_pad), VMEM-resident
        b = wb_refs[2 * i + 1][...]              # (1, OUT_pad) broadcasts over rows
        # Dropout(p) in eval mode == identity; Linear + ReLU fused on MXU+VPU.
        h = jnp.dot(h, w, preferred_element_type=jnp.float32) + b
        h = jnp.maximum(h, 0.0)
    o_ref[...] = h.astype(o_ref.dtype)


def init_mlp_params(layers, key, dtype=jnp.float32):
    """Parameter init matching MLPLayers.__init__ shapes.

    PyTorch Linear weight is (out, in) with normal_(0, 0.01); we store the
    transposed (in, out) version so the kernel computes x @ w directly.
    Bias follows PyTorch's default U(-1/sqrt(in), 1/sqrt(in)) init.
    """
    params = []
    for in_size, out_size in zip(layers[:-1], layers[1:]):
        key, kw, kb = jax.random.split(key, 3)
        w = 0.01 * jax.random.normal(kw, (in_size, out_size), dtype=dtype)
        bound = 1.0 / jnp.sqrt(jnp.asarray(in_size, dtype))
        b = jax.random.uniform(
            kb, (1, out_size), dtype=dtype, minval=-bound, maxval=bound
        )
        params.append((w, b))
    return params


def _pick_batch_tile(B, dims_p, itemsize):
    """Largest sublane-aligned batch tile that keeps the pipeline comfortably
    inside the default scoped-VMEM window (weights resident + double-buffered
    activation tiles), capped so large batches still split across >=2 cores."""
    weight_bytes = sum(
        ip * op * itemsize + op * itemsize
        for ip, op in zip(dims_p[:-1], dims_p[1:])
    )
    budget = 12 * 1024 * 1024  # conservative slice of the ~16-32 MiB scoped VMEM
    max_feat = max(dims_p)
    tm = 512
    # 2x for double-buffering of the in/out tiles; intermediates live in vregs/VMEM.
    while tm > _SUBLANE and (
        weight_bytes + 2 * tm * (dims_p[0] + dims_p[-1]) * itemsize
        + tm * max_feat * itemsize
    ) > budget:
        tm //= 2
    tm = max(_SUBLANE, tm)
    return min(tm, _round_up(B, _SUBLANE))


@jax.jit
def mlp_forward(x, params):
    """Forward pass of MLPLayers (eval mode, use_bn=False) via one fused kernel."""
    B, in_dim = x.shape
    num_layers = len(params)
    dims = [in_dim] + [w.shape[1] for w, _ in params]
    assert all(w.shape[0] == d for (w, _), d in zip(params, dims[:-1]))

    itemsize = jnp.dtype(x.dtype).itemsize

    # ---- lane-dense padding of feature dims (zero pad => exact through ReLU) ----
    dims_p = [_round_up(d, _LANE) for d in dims]

    # ---- batch tiling ----
    tm = _pick_batch_tile(B, dims_p, itemsize)
    B_pad = _round_up(B, tm)
    grid = (B_pad // tm,)

    x_p = jnp.zeros((B_pad, dims_p[0]), x.dtype).at[:B, :in_dim].set(x)

    flat_inputs = [x_p]
    in_specs = [pl.BlockSpec((tm, dims_p[0]), lambda i: (i, 0))]
    for li, (w, b) in enumerate(params):
        ip, op = dims_p[li], dims_p[li + 1]
        w_p = jnp.zeros((ip, op), w.dtype).at[: w.shape[0], : w.shape[1]].set(w)
        b_p = jnp.zeros((1, op), b.dtype).at[:, : b.shape[1]].set(b)  # pads MUST be 0
        flat_inputs += [w_p, b_p]
        # Weights/biases resident across the batch grid axis (same block index
        # every step -> fetched once, kept in VMEM).
        in_specs += [
            pl.BlockSpec((ip, op), lambda i: (0, 0)),
            pl.BlockSpec((1, op), lambda i: (0, 0)),
        ]

    out_p_dim = dims_p[-1]
    out_specs = pl.BlockSpec((tm, out_p_dim), lambda i: (i, 0))
    out_shape = jax.ShapeDtypeStruct((B_pad, out_p_dim), x.dtype)

    flops = sum(2 * B_pad * ip + 2 * B_pad * ip * op
                for ip, op in zip(dims_p[:-1], dims_p[1:]))
    bytes_accessed = (
        x_p.size * itemsize
        + sum(a.size * a.dtype.itemsize for a in flat_inputs[1:])
        + B_pad * out_p_dim * itemsize
    )

    out_padded = pl.pallas_call(
        functools.partial(_fused_mlp_kernel, num_layers=num_layers),
        out_shape=out_shape,
        grid=grid,
        in_specs=in_specs,
        out_specs=out_specs,
        compiler_params=pltpu.CompilerParams(
            dimension_semantics=("parallel",),
        ),
        cost_estimate=pl.CostEstimate(
            flops=flops, transcendentals=0, bytes_accessed=bytes_accessed
        ),
    )(*flat_inputs)

    return out_padded[:B, : dims[-1]]


def _reference_forward(x, params):
    h = x
    for w, b in params:
        h = jnp.maximum(h @ w + b, 0.0)
    return h


if __name__ == "__main__":
    key = jax.random.PRNGKey(0)
    layers = [32, 64, 16]          # MLPLayers(layers=[32, 64, 16], dropout=0.2)
    batch = 8

    key, kx, kp = jax.random.split(key, 3)
    x = jax.random.normal(kx, (batch, layers[0]), dtype=jnp.float32)
    params = init_mlp_params(layers, kp)

    out = mlp_forward(x, params)
    jax.block_until_ready(out)

    ref = _reference_forward(x, params)
    assert out.shape == (batch, layers[-1])
    assert jnp.allclose(out, ref, atol=1e-5, rtol=1e-5)

    print("KERNEL_OK")
</pallas_src>

<mosaic_0001>
module attributes {stable_mosaic.version = 11 : i64} {
  func.func @_fused_mlp_kernel(%arg0: i32, %arg1: memref<8x128xf32, #tpu.memory_space<vmem>>, %arg2: memref<128x128xf32, #tpu.memory_space<vmem>>, %arg3: memref<1x128xf32, #tpu.memory_space<vmem>>, %arg4: memref<128x128xf32, #tpu.memory_space<vmem>>, %arg5: memref<1x128xf32, #tpu.memory_space<vmem>>, %arg6: memref<8x128xf32, #tpu.memory_space<vmem>>) attributes {dimension_semantics = [#tpu.dimension_semantics<parallel>], iteration_bounds = array<i64: 1>, scalar_prefetch = 0 : i64, scratch_operands = 0 : i64, tpu.core_type = #tpu.core_type<tc>, window_params = [{transform_indices = @transform_0, window_bounds = array<i64: 8, 128>}, {pipeline_mode = #tpu.pipeline_mode<synchronous>, transform_indices = @transform_1, window_bounds = array<i64: 128, 128>}, {pipeline_mode = #tpu.pipeline_mode<synchronous>, transform_indices = @transform_2, window_bounds = array<i64: 1, 128>}, {pipeline_mode = #tpu.pipeline_mode<synchronous>, transform_indices = @transform_3, window_bounds = array<i64: 128, 128>}, {pipeline_mode = #tpu.pipeline_mode<synchronous>, transform_indices = @transform_4, window_bounds = array<i64: 1, 128>}, {transform_indices = @transform_5, window_bounds = array<i64: 8, 128>}]} {
    %c0 = arith.constant 0 : index
    %c0_0 = arith.constant 0 : index
    %0 = vector.load %arg1[%c0, %c0_0] : memref<8x128xf32, #tpu.memory_space<vmem>>, vector<8x128xf32>
    %c0_1 = arith.constant 0 : index
    %c0_2 = arith.constant 0 : index
    %1 = vector.load %arg2[%c0_1, %c0_2] : memref<128x128xf32, #tpu.memory_space<vmem>>, vector<128x128xf32>
    %c0_3 = arith.constant 0 : index
    %c0_4 = arith.constant 0 : index
    %2 = vector.load %arg3[%c0_3, %c0_4] : memref<1x128xf32, #tpu.memory_space<vmem>>, vector<1x128xf32>
    %cst = arith.constant dense<0.000000e+00> : vector<8x128xf32>
    %3 = tpu.matmul %0, %1, %cst {dimension_numbers = #tpu.dot_dimension_numbers<[1], [0], [0], [1], [0, 0, 1, 1], [], []>} : vector<8x128xf32>, vector<128x128xf32>, vector<8x128xf32> -> vector<8x128xf32>
    %4 = vector.broadcast %2 : vector<1x128xf32> to vector<8x128xf32>
    %5 = arith.addf %3, %4 : vector<8x128xf32>
    %cst_5 = arith.constant 0.000000e+00 : f32
    %6 = vector.broadcast %cst_5 : f32 to vector<8x128xf32>
    %7 = arith.maximumf %5, %6 : vector<8x128xf32>
    %c0_6 = arith.constant 0 : index
    %c0_7 = arith.constant 0 : index
    %8 = vector.load %arg4[%c0_6, %c0_7] : memref<128x128xf32, #tpu.memory_space<vmem>>, vector<128x128xf32>
    %c0_8 = arith.constant 0 : index
    %c0_9 = arith.constant 0 : index
    %9 = vector.load %arg5[%c0_8, %c0_9] : memref<1x128xf32, #tpu.memory_space<vmem>>, vector<1x128xf32>
    %cst_10 = arith.constant dense<0.000000e+00> : vector<8x128xf32>
    %10 = tpu.matmul %7, %8, %cst_10 {dimension_numbers = #tpu.dot_dimension_numbers<[1], [0], [0], [1], [0, 0, 1, 1], [], []>} : vector<8x128xf32>, vector<128x128xf32>, vector<8x128xf32> -> vector<8x128xf32>
    %11 = vector.broadcast %9 : vector<1x128xf32> to vector<8x128xf32>
    %12 = arith.addf %10, %11 : vector<8x128xf32>
    %cst_11 = arith.constant 0.000000e+00 : f32
    %13 = vector.broadcast %cst_11 : f32 to vector<8x128xf32>
    %14 = arith.maximumf %12, %13 : vector<8x128xf32>
    %c0_12 = arith.constant 0 : index
    %c0_13 = arith.constant 0 : index
    %15 = vector.load %arg6[%c0_12, %c0_13] : memref<8x128xf32, #tpu.memory_space<vmem>>, vector<8x128xf32>
    tpu.vector_store %arg6[%c0_12, %c0_13], %14 {strides = array<i32>} : memref<8x128xf32, #tpu.memory_space<vmem>>, vector<8x128xf32>,
    return
  }
  func.func @transform_0(%arg0: i32) -> (i32, i32) {
    %c0_i32 = arith.constant 0 : i32
    %c0_i32_0 = arith.constant 0 : i32
    return %arg0, %c0_i32 : i32, i32
  }
  func.func @transform_1(%arg0: i32) -> (i32, i32) {
    %c0_i32 = arith.constant 0 : i32
    %c0_i32_0 = arith.constant 0 : i32
    %c0_i32_1 = arith.constant 0 : i32
    return %c0_i32, %c0_i32_0 : i32, i32
  }
  func.func @transform_2(%arg0: i32) -> (i32, i32) {
    %c0_i32 = arith.constant 0 : i32
    %c0_i32_0 = arith.constant 0 : i32
    %c0_i32_1 = arith.constant 0 : i32
    return %c0_i32, %c0_i32_0 : i32, i32
  }
  func.func @transform_3(%arg0: i32) -> (i32, i32) {
    %c0_i32 = arith.constant 0 : i32
    %c0_i32_0 = arith.constant 0 : i32
    %c0_i32_1 = arith.constant 0 : i32
    return %c0_i32, %c0_i32_0 : i32, i32
  }
  func.func @transform_4(%arg0: i32) -> (i32, i32) {
    %c0_i32 = arith.constant 0 : i32
    %c0_i32_0 = arith.constant 0 : i32
    %c0_i32_1 = arith.constant 0 : i32
    return %c0_i32, %c0_i32_0 : i32, i32
  }
  func.func @transform_5(%arg0: i32) -> (i32, i32) {
    %c0_i32 = arith.constant 0 : i32
    %c0_i32_0 = arith.constant 0 : i32
    return %arg0, %c0_i32 : i32, i32
  }
}

</mosaic_0001>

<bundles_post_ra>
// kernel: mlp_forward.1
= control target key start
LH: loop header
LB: loop body
LE: loop exit
PB: predicated region body
PF: predicated region fallthrough
CT: control target
= control target key end

     0   :  { %s289_s0 = inlined_call_operand.vmem [shape: f32[8,128], index: 0, kind: input, shape index: {}]   ;;  %s290_s1 = inlined_call_operand.vmem [shape: f32[128,128], index: 1, kind: input, shape index: {}]   ;;  %s291_s2 = inlined_call_operand.vmem [shape: f32[1,128], index: 2, kind: input, shape index: {}]   ;;  %s292_s3 = inlined_call_operand.vmem [shape: f32[128,128], index: 3, kind: input, shape index: {}]   ;;  %s293_s4 = inlined_call_operand.vmem [shape: f32[1,128], index: 4, kind: input, shape index: {}]   ;;  %s294_s5 = inlined_call_operand.hbm [shape: f32[8,128], index: 5, kind: output, shape index: {}]  }
   0x1   :  { %v37_v0 = vld [vmem:[%s290_s1 + $0x78] sm:$0xff]  ;;  %v36_v1 = vld [vmem:[%s290_s1 + $0x70] sm:$0xff]  ;;  %v35_v2 = vld [vmem:[%s290_s1 + $0x68] sm:$0xff] }
   0x2   :  { %42 = vmatpush.msra.mxu0 %v37_v0  ;;  %v34_v3 = vld [vmem:[%s290_s1 + $0x60] sm:$0xff]  ;;  %v78_v4 = vld [vmem:[%s292_s3 + $0x78] sm:$0xff]  ;;  %v77_v6 = vld [vmem:[%s292_s3 + $0x70] sm:$0xff] }
   0x3   :  { %v33_v5 = vld [vmem:[%s290_s1 + $0x58] sm:$0xff]  ;;  %83 = vmatpush.msra.mxu1 %v78_v4  ;;  %v76_v7 = vld [vmem:[%s292_s3 + $0x68] sm:$0xff]  ;;  %v32_v8 = vld [vmem:[%s290_s1 + $0x50] sm:$0xff] }
   0x4   :  { %43 = vmatpush.msra.mxu0 %v36_v1  ;;  %v75_v9 = vld [vmem:[%s292_s3 + $0x60] sm:$0xff]  ;;  %v31_v10 = vld [vmem:[%s290_s1 + $0x48] sm:$0xff]  ;;  %v74_v11 = vld [vmem:[%s292_s3 + $0x58] sm:$0xff] }
   0x5   :  { %84 = vmatpush.msra.mxu1 %v77_v6 }
   0x6   :  { %44 = vmatpush.msra.mxu0 %v35_v2 }
   0x7   :  { %85 = vmatpush.msra.mxu1 %v76_v7 }
   0x8   :  { %45 = vmatpush.msra.mxu0 %v34_v3 }
   0xa   :  { %46 = vmatpush.msra.mxu0 %v33_v5 }
   0xc   :  { %47 = vmatpush.msra.mxu0 %v32_v8 }
   0xd   :  { %10 = vsyncpa [#allocation3], 0  ;;  %v30_v12 = vld [vmem:[%s290_s1 + $0x40] sm:$0xff]  ;;  %86 = vmatpush.msra.mxu1 %v75_v9  ;;  %v73_v13 = vld [vmem:[%s292_s3 + $0x50] sm:$0xff]  ;;  %s150_s11 = smov [#allocation2]  }
   0xe   :  { %48 = vmatpush.msra.mxu0 %v31_v10  ;;  %v29_v14 = vld [vmem:[%s290_s1 + $0x38] sm:$0xff]  ;;  %v72_v15 = vld [vmem:[%s292_s3 + $0x48] sm:$0xff]  ;;  %v28_v16 = vld [vmem:[%s290_s1 + $0x30] sm:$0xff]  ;;  %s110_s12 = sshll.u32 %s150_s11, 4  ;;  %s111_s12 = int_to_ptr.vmem [resolvable:$true] %s110_s12 }
   0xf   :  { %87 = vmatpush.msra.mxu1 %v74_v11  ;;  %v71_v17 = vld [vmem:[%s292_s3 + $0x40] sm:$0xff]  ;;  %v27_v18 = vld [vmem:[%s290_s1 + $0x28] sm:$0xff]  ;;  %v70_v19 = vld [vmem:[%s292_s3 + $0x38] sm:$0xff] }
  0x10   :  { %49 = vmatpush.msra.mxu0 %v30_v12  ;;  %v26_v20 = vld [vmem:[%s290_s1 + $0x20] sm:$0xff]  ;;  %v69_v21 = vld [vmem:[%s292_s3 + $0x30] sm:$0xff]  ;;  %v25_v22 = vld [vmem:[%s290_s1 + $0x18] sm:$0xff] }
  0x11   :  { %88 = vmatpush.msra.mxu1 %v73_v13  ;;  %v68_v23 = vld [vmem:[%s292_s3 + $0x28] sm:$0xff]  ;;  %v24_v24 = vld [vmem:[%s290_s1 + $0x10] sm:$0xff]  ;;  %v67_v25 = vld [vmem:[%s292_s3 + $0x20] sm:$0xff] }
  0x12   :  { %50 = vmatpush.msra.mxu0 %v29_v14  ;;  %v23_v26 = vld [vmem:[%s290_s1 + $0x8] sm:$0xff]  ;;  %v66_v27 = vld [vmem:[%s292_s3 + $0x18] sm:$0xff]  ;;  %v22_v28 = vld [vmem:[%s290_s1] sm:$0xff] }
  0x13   :  { %89 = vmatpush.msra.mxu1 %v72_v15  ;;  %v21_v29 = vld [vmem:[%s289_s0] sm:$0xff]  ;;  %v65_v30 = vld [vmem:[%s292_s3 + $0x10] sm:$0xff]  ;;  %v64_v31 = vld [vmem:[%s292_s3 + $0x8] sm:$0xff] }
  0x14   :  { %51 = vmatpush.msra.mxu0 %v28_v16  ;;  %v63_v32 = vld [vmem:[%s292_s3] sm:$0xff]  ;;  %s112_s3 = sshll.u32 %s294_s5, 4  ;;  %s113_s3 = int_to_ptr.hbm [resolvable:$true] %s112_s3 }
  0x15   :  { %90 = vmatpush.msra.mxu1 %v71_v17  ;;  %v122_v33 = vld [vmem:[%s291_s2] ss:$0 sm:$0xff] }
  0x16   :  { %52 = vmatpush.msra.mxu0 %v27_v18  ;;  %v123_v37 = vld [vmem:[%s293_s4] ss:$0 sm:$0xff] }
  0x17   :  { %91 = vmatpush.msra.mxu1 %v70_v19 }
  0x18   :  { %53 = vmatpush.msra.mxu0 %v26_v20 }
  0x19   :  { %92 = vmatpush.msra.mxu1 %v69_v21 }
  0x1a   :  { %54 = vmatpush.msra.mxu0 %v25_v22 }
  0x1b   :  { %93 = vmatpush.msra.mxu1 %v68_v23 }
  0x1c   :  { %55 = vmatpush.msra.mxu0 %v24_v24 }
  0x1d   :  { %94 = vmatpush.msra.mxu1 %v67_v25 }
  0x1e   :  { %56 = vmatpush.msra.mxu0 %v23_v26 }
  0x1f   :  { %95 = vmatpush.msra.mxu1 %v66_v27 }
  0x20   :  { %57 = vmatpush.msra.mxu0 %v22_v28 }
  0x21   :  { %58 = vmatmul.f32.vlgmr.msra.gmra.mxu0 %v21_v29  ;;  %96 = vmatpush.msra.mxu1 %v65_v30 }
  0x23   :  { %97 = vmatpush.msra.mxu1 %v64_v31 }
  0x25   :  { %98 = vmatpush.msra.mxu1 %v63_v32 }
  0x9e   :  { %v59_v34 = vpop.f32.mrf.mxu0 }
  0x9f   :  { %v60_v35 = vadd.f32 %v122_v33, %v59_v34 }
  0xa1   :  { %v62_v36 = vmax.f32 %v60_v35, 0.0 }
  0xa3   :  { %99 = vmatmul.f32.vlgmr.msra.gmra.mxu1 %v62_v36 }
 0x120   :  { %v100_v38 = vpop.f32.mrf.mxu1 }
 0x121   :  { %v101_v39 = vadd.f32 %v123_v37, %v100_v38 }
 0x123   :  { %v103_v40 = vmax.f32 %v101_v39, 0.0 }
 0x125   :  { %104 = vst [vmem:[#allocation2] sm:$0xff] %v103_v40 }
 0x126   :  { %115 = dma.vmem_to_hbm [thread:$0]  %s111_s12, 128, %s113_s3, [#allocation3]  }
 0x127   :  { %148 = dma.done.wait [#allocation3], 128  }
 0x128   :  { %149 = vsyncadd [#allocation3], 4294967168 }
 0x129   :  { %120 = vsyncpa [#allocation3], 1 }

</bundles_post_ra>
